<compile_context>
chip_gen: v5e
topology: v5e:2x2
jax: 0.10.0
libtpu: 0.0.40
codegen_flags: <defaults>
</compile_context>

<pallas_src>
from functools import partial

import jax
import jax.numpy as jnp
from jax import lax
from jax.experimental import pallas as pl
from jax.experimental.pallas import tpu as pltpu

# Set to jnp.bfloat16 on v6e/v7x for ~2-4x MXU throughput at production sizes
# (accumulation stays f32 via preferred_element_type). Kept f32 here so the
# demo matches the f32 reference bit-closely.
MATMUL_DTYPE = jnp.float32


# ----------------------------------------------------------------------------
# Pallas kernel: whole-batch attention + output projection + cross-entropy sum.
# ----------------------------------------------------------------------------
def attn_loss_kernel(enc_ref, dec_ref, lab_ref,
                     wE_ref, bE_ref, wD_ref, bD_ref,
                     wAc_ref, wAd_ref, bA_ref, wC_ref, bC_ref,
                     out_ref, *, t_real, t_pad):
    f32 = jnp.float32
    mm = MATMUL_DTYPE

    enc = enc_ref[...]                           # (B, S, 2H)
    dec = dec_ref[...]                           # (B, Tp, H)   (Tp = padded T)
    B, S, DH = enc.shape
    _, Tp, H = dec.shape

    # Batch-flattened projections (one MXU matmul each, shared weights).
    enc_f = enc.reshape(B * S, DH)               # S is a sublane multiple -> free
    dec_f = dec.reshape(B * Tp, H)               # Tp padded to sublane multiple

    E = jnp.dot(enc_f.astype(mm), wE_ref[...].astype(mm),
                preferred_element_type=f32) + bE_ref[...]        # (B*S, H)
    D = jnp.dot(dec_f.astype(mm), wD_ref[...].astype(mm),
                preferred_element_type=f32) + bD_ref[...]        # (B*Tp, H)

    E3 = E.reshape(B, S, H)
    D3 = D.reshape(B, Tp, H)

    # scores[b, t, s] = <D[b,t], E[b,s]>  — softmax over the last (lane) axis.
    scores = jnp.einsum('bth,bsh->bts', D3, E3,
                        preferred_element_type=f32)              # (B, Tp, S)
    m = jnp.max(scores, axis=-1, keepdims=True)
    ex = jnp.exp(scores - m)
    attn = ex / jnp.sum(ex, axis=-1, keepdims=True)              # (B, Tp, S)

    # context[b, t] = sum_s attn[b,t,s] * enc[b,s]  — native row-major matmul.
    context = jnp.einsum('bts,bsd->btd', attn, enc,
                         preferred_element_type=f32)             # (B, Tp, 2H)
    ctx_f = context.reshape(B * Tp, DH)

    # t = tanh(linear_A(cat(context, dec)))  — concat avoided by splitting W_A.
    t_act = jnp.tanh(
        jnp.dot(ctx_f.astype(mm), wAc_ref[...].astype(mm),
                preferred_element_type=f32)
        + jnp.dot(dec_f.astype(mm), wAd_ref[...].astype(mm),
                  preferred_element_type=f32)
        + bA_ref[...])                                           # (B*Tp, H)

    # pred = linear_C(t)
    pred = jnp.dot(t_act.astype(mm), wC_ref[...].astype(mm),
                   preferred_element_type=f32) + bC_ref[...]     # (B*Tp, V)

    # Cross-entropy: sum over valid rows of (logsumexp - picked-label logit).
    BT, V = pred.shape
    pm = jnp.max(pred, axis=-1, keepdims=True)
    lse = jnp.log(jnp.sum(jnp.exp(pred - pm), axis=-1, keepdims=True)) + pm

    lab = lab_ref[...]                                           # (B*Tp, 1) int32
    onehot = (lax.broadcasted_iota(jnp.int32, (BT, V), 1) == lab).astype(f32)
    picked = jnp.sum(pred * onehot, axis=-1, keepdims=True)      # (B*Tp, 1)

    row = lax.broadcasted_iota(jnp.int32, (BT, 1), 0)
    valid = ((row % t_pad) < t_real).astype(f32)                 # mask padded rows

    out_ref[0, 0] = jnp.sum((lse - picked) * valid)              # scalar -> SMEM


def attention_loss_pallas(enc_h, dec_h, labels, params):
    """loss = sum_t mean_b CE(pred[b,t], label[b,t]) == (1/B) * sum_{b,t} CE."""
    B, S, DH = enc_h.shape
    _, T, H = dec_h.shape
    V = params["wC"].shape[1]

    # Pad the decoder time axis to a sublane multiple so all in-kernel reshapes
    # between (B, T, .) and (B*T, .) are tile-aligned.
    T_pad = ((T + 7) // 8) * 8
    if T_pad != T:
        dec_h = jnp.pad(dec_h, ((0, 0), (0, T_pad - T), (0, 0)))
        labels = jnp.pad(labels, ((0, 0), (0, T_pad - T)))
    lab2 = labels.astype(jnp.int32).reshape(B * T_pad, 1)

    wE, bE = params["wE"], params["bE"].reshape(1, H)
    wD, bD = params["wD"], params["bD"].reshape(1, H)
    wAc, wAd = params["wA"][:DH], params["wA"][DH:]
    bA = params["bA"].reshape(1, H)
    wC, bC = params["wC"], params["bC"].reshape(1, V)

    vmem = pl.BlockSpec(memory_space=pltpu.MemorySpace.VMEM)
    ce_sum = pl.pallas_call(
        partial(attn_loss_kernel, t_real=T, t_pad=T_pad),
        out_shape=jax.ShapeDtypeStruct((1, 1), jnp.float32),
        in_specs=[vmem] * 12,
        out_specs=pl.BlockSpec(memory_space=pltpu.MemorySpace.SMEM),
    )(enc_h, dec_h, lab2, wE, bE, wD, bD, wAc, wAd, bA, wC, bC)

    return ce_sum[0, 0] / B


# ----------------------------------------------------------------------------
# Plain-JAX glue: embeddings and LSTM recurrences (PyTorch gate order i,f,g,o).
# The time-parallel input projection is hoisted out of the scan.
# ----------------------------------------------------------------------------
def lstm_layer(emb, w_ih, w_hh, b_ih, b_hh, h0, c0, reverse=False):
    xs = jnp.swapaxes(emb, 0, 1)                       # (S, B, D)
    if reverse:
        xs = xs[::-1]

    # One large matmul for all timesteps instead of S tiny ones inside the scan.
    x_gates = jnp.einsum('sbd,gd->sbg', xs, w_ih) + b_ih + b_hh   # (S, B, 4H)

    def step(carry, xg):
        h, c = carry
        gates = xg + h @ w_hh.T                        # (B, 4H)
        i, f, g, o = jnp.split(gates, 4, axis=-1)
        c_new = jax.nn.sigmoid(f) * c + jax.nn.sigmoid(i) * jnp.tanh(g)
        h_new = jax.nn.sigmoid(o) * jnp.tanh(c_new)
        return (h_new, c_new), h_new

    (hT, cT), hs = lax.scan(step, (h0, c0), x_gates)
    if reverse:
        hs = hs[::-1]
    return jnp.swapaxes(hs, 0, 1), hT, cT              # (B, S, H), (B, H), (B, H)


def attn_network_forward(params, x, y):
    """AttnNetwork.forward with criterion = CrossEntropyLoss (mean over batch)."""
    B = x.shape[0]
    H = params["hidden_dim"]
    emb_de = params["emb_de"][x]                       # (B, S_src, word_dim)
    emb_en = params["emb_en"][y]                       # (B, S_tgt, word_dim)
    zeros = jnp.zeros((B, H), jnp.float32)

    # bidirectional encoder (num_layers=1)
    out_f, _, _ = lstm_layer(emb_de, params["enc_f_w_ih"], params["enc_f_w_hh"],
                             params["enc_f_b_ih"], params["enc_f_b_hh"], zeros, zeros)
    out_b, hTb, cTb = lstm_layer(emb_de, params["enc_b_w_ih"], params["enc_b_w_hh"],
                                 params["enc_b_b_ih"], params["enc_b_b_hh"],
                                 zeros, zeros, reverse=True)
    enc_h = jnp.concatenate([out_f, out_b], axis=-1)   # (B, S_src, 2H)

    # decoder initialized from backward-direction final state (h0_enc[1], c0_enc[1])
    dec_h, _, _ = lstm_layer(emb_en[:, :-1], params["dec_w_ih"], params["dec_w_hh"],
                             params["dec_b_ih"], params["dec_b_hh"], hTb, cTb)

    labels = y[:, 1:]                                  # (B, T)
    loss = attention_loss_pallas(enc_h, dec_h, labels, params)
    return loss, (enc_h, dec_h, labels)


# ----------------------------------------------------------------------------
# Pure-JAX reference for the attention/loss hot path (numerical check).
# ----------------------------------------------------------------------------
def attention_loss_ref(enc_h, dec_h, labels, params):
    hp = lax.Precision.HIGHEST
    E = jnp.einsum('bsd,dh->bsh', enc_h, params["wE"], precision=hp) + params["bE"]
    D = jnp.einsum('bth,hk->btk', dec_h, params["wD"], precision=hp) + params["bD"]
    scores = jnp.einsum('bsh,bth->bst', E, D, precision=hp)
    attn = jax.nn.softmax(scores, axis=1)
    context = jnp.einsum('bst,bsd->btd', attn, enc_h, precision=hp)
    cat = jnp.concatenate([context, dec_h], axis=-1)
    t = jnp.tanh(jnp.einsum('btc,ch->bth', cat, params["wA"], precision=hp) + params["bA"])
    pred = jnp.einsum('bth,hv->btv', t, params["wC"], precision=hp) + params["bC"]
    logp = jax.nn.log_softmax(pred, axis=-1)
    oh = jax.nn.one_hot(labels, pred.shape[-1], dtype=jnp.float32)
    return -jnp.sum(logp * oh) / enc_h.shape[0]


# ----------------------------------------------------------------------------
# Deterministic parameter initialization (shapes per AttnNetwork.__init__).
# ----------------------------------------------------------------------------
def init_params(key, vocab_de, vocab_en, word_dim, H):
    names_shapes = [
        ("emb_de", (vocab_de, word_dim)), ("emb_en", (vocab_en, word_dim)),
        ("enc_f_w_ih", (4 * H, word_dim)), ("enc_f_w_hh", (4 * H, H)),
        ("enc_f_b_ih", (4 * H,)), ("enc_f_b_hh", (4 * H,)),
        ("enc_b_w_ih", (4 * H, word_dim)), ("enc_b_w_hh", (4 * H, H)),
        ("enc_b_b_ih", (4 * H,)), ("enc_b_b_hh", (4 * H,)),
        ("dec_w_ih", (4 * H, word_dim)), ("dec_w_hh", (4 * H, H)),
        ("dec_b_ih", (4 * H,)), ("dec_b_hh", (4 * H,)),
        ("wE", (2 * H, H)), ("bE", (H,)),          # linear_E (stored transposed)
        ("wD", (H, H)), ("bD", (H,)),              # linear_D
        ("wA", (3 * H, H)), ("bA", (H,)),          # linear_A
        ("wC", (H, vocab_en)), ("bC", (vocab_en,)),  # linear_C
    ]
    keys = jax.random.split(key, len(names_shapes))
    params = {n: jax.random.uniform(k, s, jnp.float32, -0.1, 0.1)
              for (n, s), k in zip(names_shapes, keys)}
    params["hidden_dim"] = H
    return params


if __name__ == "__main__":
    B, S_src, S_tgt = 2, 8, 8
    word_dim, H = 16, 32
    vocab_de, vocab_en = 50, 64

    root = jax.random.PRNGKey(0)
    k_par, k_x, k_y = jax.random.split(root, 3)
    params = init_params(k_par, vocab_de, vocab_en, word_dim, H)
    x = jax.random.randint(k_x, (B, S_src), 0, vocab_de, dtype=jnp.int32)
    y = jax.random.randint(k_y, (B, S_tgt), 0, vocab_en, dtype=jnp.int32)

    loss, (enc_h, dec_h, labels) = attn_network_forward(params, x, y)
    loss = jax.block_until_ready(loss)

    ref = jax.block_until_ready(attention_loss_ref(enc_h, dec_h, labels, params))
    assert abs(float(loss) - float(ref)) < 1e-2 * max(1.0, abs(float(ref))), \
        (float(loss), float(ref))
    print("KERNEL_OK")
</pallas_src>

<mosaic_0001>
module attributes {stable_mosaic.version = 11 : i64} {
  func.func @attn_loss_kernel(%arg0: memref<2x8x64xf32, #tpu.memory_space<vmem>>, %arg1: memref<2x8x32xf32, #tpu.memory_space<vmem>>, %arg2: memref<16x1xi32, #tpu.memory_space<vmem>>, %arg3: memref<64x32xf32, #tpu.memory_space<vmem>>, %arg4: memref<1x32xf32, #tpu.memory_space<vmem>>, %arg5: memref<32x32xf32, #tpu.memory_space<vmem>>, %arg6: memref<1x32xf32, #tpu.memory_space<vmem>>, %arg7: memref<64x32xf32, #tpu.memory_space<vmem>>, %arg8: memref<32x32xf32, #tpu.memory_space<vmem>>, %arg9: memref<1x32xf32, #tpu.memory_space<vmem>>, %arg10: memref<32x64xf32, #tpu.memory_space<vmem>>, %arg11: memref<1x64xf32, #tpu.memory_space<vmem>>, %arg12: memref<1x1xf32, #tpu.memory_space<smem>>) attributes {dimension_semantics = [], scalar_prefetch = 0 : i64, scratch_operands = 0 : i64, tpu.core_type = #tpu.core_type<tc>} {
    %c0 = arith.constant 0 : index
    %c0_0 = arith.constant 0 : index
    %c0_1 = arith.constant 0 : index
    %0 = vector.load %arg0[%c0, %c0_0, %c0_1] : memref<2x8x64xf32, #tpu.memory_space<vmem>>, vector<2x8x64xf32>
    %c0_2 = arith.constant 0 : index
    %c0_3 = arith.constant 0 : index
    %c0_4 = arith.constant 0 : index
    %1 = vector.load %arg1[%c0_2, %c0_3, %c0_4] : memref<2x8x32xf32, #tpu.memory_space<vmem>>, vector<2x8x32xf32>
    %2 = vector.shape_cast %0 : vector<2x8x64xf32> to vector<16x64xf32>
    %3 = vector.shape_cast %1 : vector<2x8x32xf32> to vector<16x32xf32>
    %c0_5 = arith.constant 0 : index
    %c0_6 = arith.constant 0 : index
    %4 = vector.load %arg3[%c0_5, %c0_6] : memref<64x32xf32, #tpu.memory_space<vmem>>, vector<64x32xf32>
    %cst = arith.constant dense<0.000000e+00> : vector<16x32xf32>
    %5 = tpu.matmul %2, %4, %cst {dimension_numbers = #tpu.dot_dimension_numbers<[1], [0], [0], [1], [0, 0, 1, 1], [], []>} : vector<16x64xf32>, vector<64x32xf32>, vector<16x32xf32> -> vector<16x32xf32>
    %c0_7 = arith.constant 0 : index
    %c0_8 = arith.constant 0 : index
    %6 = vector.load %arg4[%c0_7, %c0_8] : memref<1x32xf32, #tpu.memory_space<vmem>>, vector<1x32xf32>
    %7 = vector.broadcast %6 : vector<1x32xf32> to vector<16x32xf32>
    %8 = arith.addf %5, %7 : vector<16x32xf32>
    %c0_9 = arith.constant 0 : index
    %c0_10 = arith.constant 0 : index
    %9 = vector.load %arg5[%c0_9, %c0_10] : memref<32x32xf32, #tpu.memory_space<vmem>>, vector<32x32xf32>
    %cst_11 = arith.constant dense<0.000000e+00> : vector<16x32xf32>
    %10 = tpu.matmul %3, %9, %cst_11 {dimension_numbers = #tpu.dot_dimension_numbers<[1], [0], [0], [1], [0, 0, 1, 1], [], []>} : vector<16x32xf32>, vector<32x32xf32>, vector<16x32xf32> -> vector<16x32xf32>
    %c0_12 = arith.constant 0 : index
    %c0_13 = arith.constant 0 : index
    %11 = vector.load %arg6[%c0_12, %c0_13] : memref<1x32xf32, #tpu.memory_space<vmem>>, vector<1x32xf32>
    %12 = vector.broadcast %11 : vector<1x32xf32> to vector<16x32xf32>
    %13 = arith.addf %10, %12 : vector<16x32xf32>
    %14 = vector.shape_cast %8 : vector<16x32xf32> to vector<2x8x32xf32>
    %15 = vector.shape_cast %13 : vector<16x32xf32> to vector<2x8x32xf32>
    "tpu.trace_start"() <{level = 10 : i32, message = "bth,bsh->bts"}> : () -> ()
    %cst_14 = arith.constant dense<0.000000e+00> : vector<2x8x8xf32>
    %16 = tpu.matmul %15, %14, %cst_14 {dimension_numbers = #tpu.dot_dimension_numbers<[2], [2], [1], [1], [0, 0, 0, 1, 1, 1], [0], [0]>} : vector<2x8x32xf32>, vector<2x8x32xf32>, vector<2x8x8xf32> -> vector<2x8x8xf32>
    "tpu.trace_stop"() : () -> ()
    %cst_15 = arith.constant dense<0xFF800000> : vector<2x8xf32>
    %17 = vector.multi_reduction <maximumf>, %16, %cst_15 [2] : vector<2x8x8xf32> to vector<2x8xf32>
    %18 = vector.shape_cast %17 : vector<2x8xf32> to vector<2x8x1xf32>
    %19 = vector.broadcast %18 : vector<2x8x1xf32> to vector<2x8x8xf32>
    %20 = arith.subf %16, %19 : vector<2x8x8xf32>
    %21 = math.exp %20 : vector<2x8x8xf32>
    %cst_16 = arith.constant dense<0.000000e+00> : vector<2x8xf32>
    %22 = vector.multi_reduction <add>, %21, %cst_16 [2] : vector<2x8x8xf32> to vector<2x8xf32>
    %23 = vector.shape_cast %22 : vector<2x8xf32> to vector<2x8x1xf32>
    %24 = vector.broadcast %23 : vector<2x8x1xf32> to vector<2x8x8xf32>
    %25 = arith.divf %21, %24 : vector<2x8x8xf32>
    "tpu.trace_start"() <{level = 10 : i32, message = "bts,bsd->btd"}> : () -> ()
    %cst_17 = arith.constant dense<0.000000e+00> : vector<2x8x64xf32>
    %26 = tpu.matmul %25, %0, %cst_17 {dimension_numbers = #tpu.dot_dimension_numbers<[2], [1], [1], [2], [0, 0, 0, 1, 1, 2], [0], [0]>} : vector<2x8x8xf32>, vector<2x8x64xf32>, vector<2x8x64xf32> -> vector<2x8x64xf32>
    "tpu.trace_stop"() : () -> ()
    %27 = vector.shape_cast %26 : vector<2x8x64xf32> to vector<16x64xf32>
    %c0_18 = arith.constant 0 : index
    %c0_19 = arith.constant 0 : index
    %28 = vector.load %arg7[%c0_18, %c0_19] : memref<64x32xf32, #tpu.memory_space<vmem>>, vector<64x32xf32>
    %cst_20 = arith.constant dense<0.000000e+00> : vector<16x32xf32>
    %29 = tpu.matmul %27, %28, %cst_20 {dimension_numbers = #tpu.dot_dimension_numbers<[1], [0], [0], [1], [0, 0, 1, 1], [], []>} : vector<16x64xf32>, vector<64x32xf32>, vector<16x32xf32> -> vector<16x32xf32>
    %c0_21 = arith.constant 0 : index
    %c0_22 = arith.constant 0 : index
    %30 = vector.load %arg8[%c0_21, %c0_22] : memref<32x32xf32, #tpu.memory_space<vmem>>, vector<32x32xf32>
    %cst_23 = arith.constant dense<0.000000e+00> : vector<16x32xf32>
    %31 = tpu.matmul %3, %30, %cst_23 {dimension_numbers = #tpu.dot_dimension_numbers<[1], [0], [0], [1], [0, 0, 1, 1], [], []>} : vector<16x32xf32>, vector<32x32xf32>, vector<16x32xf32> -> vector<16x32xf32>
    %32 = arith.addf %29, %31 : vector<16x32xf32>
    %c0_24 = arith.constant 0 : index
    %c0_25 = arith.constant 0 : index
    %33 = vector.load %arg9[%c0_24, %c0_25] : memref<1x32xf32, #tpu.memory_space<vmem>>, vector<1x32xf32>
    %34 = vector.broadcast %33 : vector<1x32xf32> to vector<16x32xf32>
    %35 = arith.addf %32, %34 : vector<16x32xf32>
    %36 = math.tanh %35 : vector<16x32xf32>
    %c0_26 = arith.constant 0 : index
    %c0_27 = arith.constant 0 : index
    %37 = vector.load %arg10[%c0_26, %c0_27] : memref<32x64xf32, #tpu.memory_space<vmem>>, vector<32x64xf32>
    %cst_28 = arith.constant dense<0.000000e+00> : vector<16x64xf32>
    %38 = tpu.matmul %36, %37, %cst_28 {dimension_numbers = #tpu.dot_dimension_numbers<[1], [0], [0], [1], [0, 0, 1, 1], [], []>} : vector<16x32xf32>, vector<32x64xf32>, vector<16x64xf32> -> vector<16x64xf32>
    %c0_29 = arith.constant 0 : index
    %c0_30 = arith.constant 0 : index
    %39 = vector.load %arg11[%c0_29, %c0_30] : memref<1x64xf32, #tpu.memory_space<vmem>>, vector<1x64xf32>
    %40 = vector.broadcast %39 : vector<1x64xf32> to vector<16x64xf32>
    %41 = arith.addf %38, %40 : vector<16x64xf32>
    %cst_31 = arith.constant dense<0xFF800000> : vector<16xf32>
    %42 = vector.multi_reduction <maximumf>, %41, %cst_31 [1] : vector<16x64xf32> to vector<16xf32>
    %43 = vector.shape_cast %42 : vector<16xf32> to vector<16x1xf32>
    %44 = vector.broadcast %43 : vector<16x1xf32> to vector<16x64xf32>
    %45 = arith.subf %41, %44 : vector<16x64xf32>
    %46 = math.exp %45 : vector<16x64xf32>
    %cst_32 = arith.constant dense<0.000000e+00> : vector<16xf32>
    %47 = vector.multi_reduction <add>, %46, %cst_32 [1] : vector<16x64xf32> to vector<16xf32>
    %48 = vector.shape_cast %47 : vector<16xf32> to vector<16x1xf32>
    %49 = math.log %48 : vector<16x1xf32>
    %50 = arith.addf %49, %43 : vector<16x1xf32>
    %c0_33 = arith.constant 0 : index
    %c0_34 = arith.constant 0 : index
    %51 = vector.load %arg2[%c0_33, %c0_34] : memref<16x1xi32, #tpu.memory_space<vmem>>, vector<16x1xi32>
    %52 = tpu.iota {dimensions = array<i32: 1>} : vector<16x64xi32>
    %53 = vector.broadcast %51 : vector<16x1xi32> to vector<16x64xi32>
    %54 = arith.cmpi eq, %52, %53 : vector<16x64xi32>
    %55 = arith.extui %54 : vector<16x64xi1> to vector<16x64xi32>
    %56 = arith.sitofp %55 : vector<16x64xi32> to vector<16x64xf32>
    %57 = arith.mulf %41, %56 : vector<16x64xf32>
    %cst_35 = arith.constant dense<0.000000e+00> : vector<16xf32>
    %58 = vector.multi_reduction <add>, %57, %cst_35 [1] : vector<16x64xf32> to vector<16xf32>
    %59 = vector.shape_cast %58 : vector<16xf32> to vector<16x1xf32>
    %60 = tpu.iota {dimensions = array<i32: 0>} : vector<16x1xi32>
    %c8_i32 = arith.constant 8 : i32
    %c0_i32 = arith.constant 0 : i32
    %61 = arith.cmpi eq, %c8_i32, %c0_i32 : i32
    %c1_i32 = arith.constant 1 : i32
    %62 = arith.select %61, %c1_i32, %c8_i32 : i32
    %63 = vector.broadcast %62 : i32 to vector<16x1xi32>
    %64 = arith.remsi %60, %63 : vector<16x1xi32>
    %c0_i32_36 = arith.constant 0 : i32
    %65 = vector.broadcast %c0_i32_36 : i32 to vector<16x1xi32>
    %66 = arith.cmpi ne, %64, %65 : vector<16x1xi32>
    %c0_i32_37 = arith.constant 0 : i32
    %67 = vector.broadcast %c0_i32_37 : i32 to vector<16x1xi32>
    %68 = arith.cmpi slt, %64, %67 : vector<16x1xi32>
    %c0_i32_38 = arith.constant 0 : i32
    %69 = arith.cmpi slt, %62, %c0_i32_38 : i32
    %70 = vector.broadcast %69 : i1 to vector<16x1xi1>
    %71 = vector.broadcast %70 : vector<16x1xi1> to vector<16x1xi1>
    %72 = arith.xori %68, %71 : vector<16x1xi1>
    %73 = arith.andi %72, %66 : vector<16x1xi1>
    %74 = vector.broadcast %62 : i32 to vector<16x1xi32>
    %75 = arith.addi %64, %74 : vector<16x1xi32>
    %76 = arith.select %73, %75, %64 : vector<16x1xi1>, vector<16x1xi32>
    %c7_i32 = arith.constant 7 : i32
    %77 = vector.broadcast %c7_i32 : i32 to vector<16x1xi32>
    %78 = arith.cmpi slt, %76, %77 : vector<16x1xi32>
    %79 = arith.extui %78 : vector<16x1xi1> to vector<16x1xi32>
    %80 = arith.sitofp %79 : vector<16x1xi32> to vector<16x1xf32>
    %81 = arith.subf %50, %59 : vector<16x1xf32>
    %82 = arith.mulf %81, %80 : vector<16x1xf32>
    %83 = vector.shape_cast %82 : vector<16x1xf32> to vector<1x16x1xf32>
    %cst_39 = arith.constant dense<0.000000e+00> : vector<1xf32>
    %84 = vector.multi_reduction <add>, %83, %cst_39 [1, 2] : vector<1x16x1xf32> to vector<1xf32>
    %85 = vector.shape_cast %84 : vector<1xf32> to vector<1x1x1xf32>
    %86 = vector.extract %85[0, 0, 0] : f32 from vector<1x1x1xf32>
    %c0_40 = arith.constant 0 : index
    %c0_41 = arith.constant 0 : index
    %87 = memref.load %arg12[%c0_40, %c0_41] : memref<1x1xf32, #tpu.memory_space<smem>>
    memref.store %86, %arg12[%c0_40, %c0_41] : memref<1x1xf32, #tpu.memory_space<smem>>
    return
  }
}

</mosaic_0001>

<bundles_post_ra>
// kernel: tpu_custom_call.1
= control target key start
LH: loop header
LB: loop body
LE: loop exit
PB: predicated region body
PF: predicated region fallthrough
CT: control target
= control target key end

     0   :  { %vm96_vm0 = vcmask 261120   ;;  %s781_s0 = inlined_call_operand.vmem [shape: f32[2,8,64], index: 0, kind: input, shape index: {}]   ;;  %s782_s1 = inlined_call_operand.vmem [shape: f32[2,8,32], index: 1, kind: input, shape index: {}]   ;;  %s783_s2 = inlined_call_operand.vmem [shape: s32[16,1], index: 2, kind: input, shape index: {}]   ;;  %s784_s3 = inlined_call_operand.vmem [shape: f32[64,32], index: 3, kind: input, shape index: {}]   ;;  %s785_s4 = inlined_call_operand.vmem [shape: f32[1,32], index: 4, kind: input, shape index: {}]   ;;  %s786_s5 = inlined_call_operand.vmem [shape: f32[32,32], index: 5, kind: input, shape index: {}]   ;;  %s787_s6 = inlined_call_operand.vmem [shape: f32[1,32], index: 6, kind: input, shape index: {}]   ;;  %s788_s7 = inlined_call_operand.vmem [shape: f32[64,32], index: 7, kind: input, shape index: {}]   ;;  %s789_s8 = inlined_call_operand.vmem [shape: f32[32,32], index: 8, kind: input, shape index: {}]   ;;  %s790_s9 = inlined_call_operand.vmem [shape: f32[1,32], index: 9, kind: input, shape index: {}]   ;;  %s791_s10 = inlined_call_operand.vmem [shape: f32[32,64], index: 10, kind: input, shape index: {}]   ;;  %s792_s11 = inlined_call_operand.vmem [shape: f32[1,64], index: 11, kind: input, shape index: {}]   ;;  %s793_s12 = inlined_call_operand.hbm [shape: f32[1,1], index: 12, kind: output, shape index: {}]  }
   0x1   :  { %v53_v0 = vld [vmem:[%s784_s3 + $0x38] sm:$0xff]  ;;  %v52_v1 = vld [vmem:[%s784_s3 + $0x30] sm:$0xff]  ;;  %v51_v2 = vld [vmem:[%s784_s3 + $0x28] sm:$0xff] }
   0x2   :  { %73 = vmatpush.msra.mxu0 %v53_v0  ;;  %v91_v3 = vld [vmem:[%s786_s5 + $0x18] sm:$0xff]  ;;  %v90_v4 = vld [vmem:[%s786_s5 + $0x10] sm:$0xff]  ;;  %v50_v5 = vld [vmem:[%s784_s3 + $0x20] sm:$0xff] }
   0x3   :  { %115 = vmatpush.msra.mxu1 %v91_v3  ;;  %v89_v6 = vld [vmem:[%s786_s5 + $0x8] sm:$0xff]  ;;  %v49_v7 = vld [vmem:[%s784_s3 + $0x18] sm:$0xff]  ;;  %v88_v8 = vld [vmem:[%s786_s5] sm:$0xff] }
   0x4   :  { %74 = vmatpush.msra.mxu0 %v52_v1  ;;  %v660_v9 = vld [vmem:[%s782_s1] sm:$0xff] }
   0x5   :  { %116 = vmatpush.msra.mxu1 %v90_v4 }
   0x6   :  { %75 = vmatpush.msra.mxu0 %v51_v2 }
   0x7   :  { %117 = vmatpush.msra.mxu1 %v89_v6 }
   0x8   :  { %76 = vmatpush.msra.mxu0 %v50_v5 }
   0x9   :  { %17 = vsyncpa [#allocation3], 0  ;;  %v48_v10 = vld [vmem:[%s784_s3 + $0x10] sm:$0xff]  ;;  %118 = vmatpush.msra.mxu1 %v88_v8  ;;  %v47_v11 = vld [vmem:[%s784_s3 + $0x8] sm:$0xff]  ;;  %vm58_vm1 = vcmask 523264   ;;  %vm178_vm2 = vcmask 64512  }
   0xa   :  { %77 = vmatpush.msra.mxu0 %v49_v7  ;;  %499 = vmatmul.msk.f32.vlgmr.msra.gmra.mxu1 %vm96_vm0, %v660_v9  ;;  %v46_v12 = vld [vmem:[%s784_s3] sm:$0xff]  ;;  %v679_v14 = vld [vmem:[%s782_s1 + $0x8] sm:$0xff]  ;;  %v280_v40 = vld [vmem:[%s788_s7 + $0x38] sm:$0xff]  ;;  %vm467_vm15 = vcmask 7168   ;;  %s487_s5 = sshll.u32 %s793_s12, 4  ;;  %s564_s28 = smov [#allocation2]   ;;  %s488_s5 = int_to_ptr.hbm [resolvable:$true] %s487_s5 }
   0xb   :  { %v42_v13 = vld [vmem:[%s781_s0] sm:$0xff]  ;;  %v43_v15 = vld [vmem:[%s781_s0 + $0x8] sm:$0xff]  ;;  %v284_v41 = vld [vmem:[%s789_s8 + $0x18] sm:$0xff]  ;;  %322 = vmatpush.msrb.mxu1 %v280_v40 }
   0xc   :  { %78 = vmatpush.msra.mxu0 %v48_v10  ;;  %v524_v16 = vld [vmem:[%s785_s4] ss:$0 sm:$0xff]  ;;  %v279_v42 = vld [vmem:[%s788_s7 + $0x30] sm:$0xff]  ;;  %v278_v44 = vld [vmem:[%s788_s7 + $0x28] sm:$0xff] }
   0xd   :  { %v525_v18 = vld [vmem:[%s787_s6] ss:$0 sm:$0xff]  ;;  %v283_v43 = vld [vmem:[%s789_s8 + $0x10] sm:$0xff]  ;;  %v282_v45 = vld [vmem:[%s789_s8 + $0x8] sm:$0xff]  ;;  %323 = vmatpush.msrb.mxu1 %v279_v42 }
   0xe   :  { %79 = vmatpush.msra.mxu0 %v47_v11  ;;  %v277_v47 = vld [vmem:[%s788_s7 + $0x20] sm:$0xff]  ;;  %v276_v49 = vld [vmem:[%s788_s7 + $0x18] sm:$0xff]  ;;  %v275_v50 = vld [vmem:[%s788_s7 + $0x10] sm:$0xff] }
   0xf   :  { %v281_v48 = vld [vmem:[%s789_s8] sm:$0xff]  ;;  %324 = vmatpush.msrb.mxu1 %v278_v44  ;;  %v274_v51 = vld [vmem:[%s788_s7 + $0x8] sm:$0xff]  ;;  %v408_v44 = vlaneseq }
  0x10   :  { %80 = vmatpush.msra.mxu0 %v46_v12  ;;  %v273_v55 = vld [vmem:[%s788_s7] sm:$0xff] }
  0x11   :  { %497 = vmatmul.msk.f32.vlgmr.msra.gmra.mxu0 %vm58_vm1, %v42_v13  ;;  %325 = vmatpush.msrb.mxu1 %v277_v47 }
  0x12   :  { %500 = vmatmul.msk.f32.gmra.mxu1 %vm96_vm0, %v679_v14 }
  0x13   :  { %326 = vmatpush.msrb.mxu1 %v276_v49 }
  0x15   :  { %327 = vmatpush.msrb.mxu1 %v275_v50 }
  0x17   :  { %328 = vmatpush.msrb.mxu1 %v274_v51 }
  0x19   :  { %498 = vmatmul.msk.f32.gmra.mxu0 %vm58_vm1, %v43_v15  ;;  %329 = vmatpush.msrb.mxu1 %v273_v55 }
  0x87   :  { %v120_v17 = vpop.f32.mrf.mxu1 }
  0x88   :  { %v121_v21 = vadd.f32 %v525_v18, %v120_v17  ;;  %v347_v17 = vld [vmem:[%s791_s10 + $0x10] sm:$0xff] }
  0x8e   :  { %v82_v19 = vpop.f32.mrf.mxu0 }
  0x8f   :  { %v83_v20 = vadd.f32 %v524_v16, %v82_v19  ;;  %v123_v22 = vpop.f32.mrf.mxu1  ;;  %v407_v19 = vld [vmem:[%s783_s2 + $0x8] sm:$0xff] }
  0x90   :  { %v124_v25 = vadd.f32 %v525_v18, %v123_v22  ;;  %v406_v18 = vld [vmem:[%s783_s2] sm:$0xff] }
  0x91   :  { %501 = vmatpush.xpose.msk.msra.mxu2 %vm96_vm0, %v83_v20  ;;  %v562_v20 = vmov 0   ;;  %v526_v22 = vld [vmem:[%s790_s9] ss:$0 sm:$0xff] }
  0x92   :  { %522 = vset.pattern.permute.xlu0 %v562_v20  ;;  %523 = vset.pattern.permute.xlu1 %v562_v20 }
  0x94   :  { %502 = vmatmul.msk.f32.vlgmr.msra.gmra.mxu2 %vm96_vm0, %v121_v21 }
  0x95   :  { %245 = vmatpush.msrb.mxu2 %v42_v13 }
  0x96   :  { %v85_v23 = vpop.f32.mrf.mxu0 }
  0x97   :  { %v86_v24 = vadd.f32 %v524_v16, %v85_v23  ;;  %297 = vmatpush.msra.mxu2 %v284_v41  ;;  %v348_v16 = vld [vmem:[%s791_s10 + $0x18] sm:$0xff] }
  0x99   :  { %503 = vmatpush.xpose.msk.msra.mxu3 %vm96_vm0, %v86_v24  ;;  %298 = vmatpush.msra.mxu2 %v283_v43 }
  0x9b   :  { %299 = vmatpush.msra.mxu2 %v282_v45 }
  0x9c   :  { %504 = vmatmul.msk.f32.vlgmr.msra.gmra.mxu3 %vm96_vm0, %v124_v25 }
  0x9d   :  { %268 = vmatpush.msrb.mxu3 %v43_v15  ;;  %300 = vmatpush.msra.mxu2 %v281_v48  ;;  %v409_v48 = vand.u32 127, %v408_v44 }
  0x9f   :  { %371 = vmatpush.msra.mxu3 %v348_v16 }
  0xa1   :  { %372 = vmatpush.msra.mxu3 %v347_v17 }
 0x117   :  { %v149_v26 = vpop.f32.mrf.mxu2 }
 0x118   :  { %v179_v27 = vsel %vm178_vm2, %v149_v26, -inf }
 0x119   :  { %180 = vmax.xlane.f32.xlu0 %v179_v27 }
 0x11f   :  { %v175_v28 = vpop.f32.mrf.mxu3 }
 0x120   :  { %v182_v29 = vsel %vm178_vm2, %v175_v28, -inf }
 0x121   :  { %183 = vmax.xlane.f32.xlu0 %v182_v29 }
 0x135   :  { %411 = vperm.xlu0 %522, %v406_v18  }
 0x18c   :  { %v181_v30 = vpop.xlane.xlu0 %180 }
 0x18d   :  { %v185_v31 = vsub.f32 %v149_v26, %v181_v30 }
 0x18f   :  { %v187_v32 = vmul.f32 1.442695, %v185_v31 }
 0x191   :  { %528 = vpow2.f32 %v187_v32  ;;  %v527_v32 = vld [vmem:[%s792_s11] ss:$0 sm:$0xff] }
 0x194   :  { %v184_v33 = vpop.xlane.xlu0 %183 }
 0x195   :  { %v186_v34 = vsub.f32 %v175_v28, %v184_v33 }
 0x197   :  { %v529_v35 = vpop.eup %528  ;;  %v189_v36 = vmul.f32 1.442695, %v186_v34 }
 0x198   :  { %v191_v37 = vsel %vm178_vm2, %v529_v35, 0.0 }
 0x199   :  { %530 = vpow2.f32 %v189_v36  ;;  %192 = vadd.xlane.f32.xlu1 %v191_v37 }
 0x19f   :  { %v531_v38 = vpop.eup %530 }
 0x1a0   :  { %v194_v39 = vsel %vm178_vm2, %v531_v38, 0.0 }
 0x1a1   :  { %195 = vadd.xlane.f32.xlu1 %v194_v39 }
 0x1a7   :  { %v412_v49 = vpop.permute.xlu0 %411 }
 0x1a8   :  { %vm416_vm11 = vcmp.eq.s32.totalorder %v409_v48, %v412_v49 }
 0x1ba   :  { %414 = vperm.xlu1 %523, %v407_v19  }
 0x20c   :  { %v193_v46 = vpop.xlane.xlu1 %192 }
 0x20d   :  { %532 = vrcp.f32 %v193_v46  ;;  %v208_v57 = vand.u32 2147483648, %v193_v46  ;;  %v206_v59 = vand.u32 2147483647, %v193_v46  ;;  %vm202_vm4 = vweird.f32 %v193_v46 }
 0x20f   :  { %v209_v62 = vor.u32 1.1754944e-38, %v208_v57  ;;  %vm207_vm6 = vcmp.eq.f32.partialorder %v206_v59, 8.507059e+37 }
 0x213   :  { %v533_v52 = vpop.eup %532 }
 0x214   :  { %v198_v53 = vmul.f32 %v533_v52, %v193_v46  ;;  %v196_v54 = vpop.xlane.xlu1 %195  ;;  %vm203_vm3 = vweird.f32 %v533_v52 }
 0x215   :  { %534 = vrcp.f32 %v196_v54  ;;  %vm204_vm5 = vmor %vm202_vm4, %vm203_vm3  ;;  %v223_v4 = vand.u32 2147483648, %v196_v54  ;;  %v221_v6 = vand.u32 2147483647, %v196_v54  ;;  %vm217_vm8 = vweird.f32 %v196_v54 }
 0x216   :  { %v199_v56 = vsub.f32 1.0, %v198_v53 }
 0x217   :  { %v224_v8 = vor.u32 1.1754944e-38, %v223_v4  ;;  %vm222_vm10 = vcmp.eq.f32.partialorder %v221_v6, 8.507059e+37 }
 0x218   :  { %v200_v58 = vmul.f32 %v533_v52, %v199_v56 }
 0x21a   :  { %v201_v60 = vadd.f32 %v533_v52, %v200_v58 }
 0x21b   :  { %v535_v61 = vpop.eup %534 }
 0x21c   :  { %v213_v63 = vmul.f32 %v535_v61, %v196_v54  ;;  %v205_v0 = vsel %vm204_vm5, %v533_v52, %v201_v60  ;;  %vm218_vm7 = vweird.f32 %v535_v61  ;;  %v563_v52 = vmov 0.0  }
 0x21d   :  { %v210_v1 = vsel %vm207_vm6, %v209_v62, %v205_v0  ;;  %vm219_vm9 = vmor %vm217_vm8, %vm218_vm7  ;;  %v513_v53 = vsel %vm416_vm11, 1.0, %v563_v52  ;;  %v431_v62 = vshrl.u32 %v408_v44, 7 }
 0x21e   :  { %v214_v2 = vsub.f32 1.0, %v213_v63  ;;  %v211_v3 = vmul.f32 %v529_v35, %v210_v1 }
 0x21f   :  { %v432_v0 = vadd.s32 8, %v431_v62 }
 0x220   :  { %v215_v5 = vmul.f32 %v535_v61, %v214_v2  ;;  %505 = vmatmul.msk.f32.vlgmr.msrb.gmra.mxu2 %vm178_vm2, %v211_v3  ;;  %v437_v2 = vand.u32 7, %v431_v62 }
 0x222   :  { %v216_v7 = vadd.f32 %v535_v61, %v215_v5  ;;  %v444_v5 = vand.u32 7, %v432_v0  ;;  %vm457_vm13 = vcmp.lt.s32.totalorder %v437_v2, 7 }
 0x224   :  { %v220_v10 = vsel %vm219_vm9, %v535_v61, %v216_v7  ;;  %vm458_vm14 = vcmp.lt.s32.totalorder %v444_v5, 7 }
 0x225   :  { %v225_v11 = vsel %vm222_vm10, %v224_v8, %v220_v10  ;;  %v515_v10 = vsel %vm457_vm13, 1.0, %v563_v52 }
 0x226   :  { %v226_v12 = vmul.f32 %v531_v38, %v225_v11 }
 0x228   :  { %506 = vmatmul.msk.f32.vlgmr.msrb.gmra.mxu3 %vm178_vm2, %v226_v12  ;;  %507 = vmatmul.msk.f32.vlgmr.msra.gmra.mxu2 %vm96_vm0, %v660_v9  ;;  %v346_v9 = vld [vmem:[%s791_s10 + $0x8] sm:$0xff]  ;;  %v516_v12 = vsel %vm458_vm14, 1.0, %v563_v52 }
 0x229   :  { %373 = vmatpush.msra.mxu3 %v346_v9 }
 0x22c   :  { %v415_v54 = vpop.permute.xlu1 %414 }
 0x22d   :  { %vm417_vm12 = vcmp.eq.s32.totalorder %v409_v48, %v415_v54 }
 0x22e   :  { %v514_v57 = vsel %vm417_vm12, 1.0, %v563_v52 }
 0x230   :  { %508 = vmatmul.msk.f32.gmra.mxu2 %vm96_vm0, %v679_v14  ;;  %v345_v14 = vld [vmem:[%s791_s10] sm:$0xff] }
 0x231   :  { %374 = vmatpush.msra.mxu3 %v345_v14 }
 0x2a3   :  { %v247_v13 = vpop.f32.mrf.mxu2 }
 0x2a4   :  { %509 = vmatmul.msk.f32.vlgmr.msrb.gmra.mxu1 %vm58_vm1, %v247_v13 }
 0x2ab   :  { %v270_v15 = vpop.f32.mrf.mxu3  ;;  %v302_v21 = vpop.f32.mrf.mxu2 }
 0x2ac   :  { %510 = vmatmul.msk.f32.gmra.mxu1 %vm58_vm1, %v270_v15 }
 0x2b3   :  { %v305_v26 = vpop.f32.mrf.mxu2 }
 0x321   :  { %v331_v23 = vpop.f32.mrf.mxu1 }
 0x322   :  { %v332_v24 = vadd.f32 %v331_v23, %v302_v21 }
 0x324   :  { %v341_v25 = vadd.f32 %v526_v22, %v332_v24 }
 0x326   :  { %536 = vtanh.f32 %v341_v25 }
 0x329   :  { %v334_v27 = vpop.f32.mrf.mxu1 }
 0x32a   :  { %v335_v28 = vadd.f32 %v334_v27, %v305_v26 }
 0x32c   :  { %v537_v29 = vpop.eup %536  ;;  %v342_v30 = vadd.f32 %v526_v22, %v335_v28 }
 0x32d   :  { %511 = vmatmul.msk.f32.vlgmr.msra.gmra.mxu3 %vm96_vm0, %v537_v29 }
 0x32e   :  { %538 = vtanh.f32 %v342_v30 }
 0x334   :  { %v539_v31 = vpop.eup %538 }
 0x335   :  { %512 = vmatmul.msk.f32.gmra.mxu3 %vm96_vm0, %v539_v31 }
 0x3b0   :  { %v376_v33 = vpop.f32.mrf.mxu3 }
 0x3b1   :  { %v377_v34 = vadd.f32 %v527_v32, %v376_v33 }
 0x3b3   :  { %v382_v35 = vsel %vm58_vm1, %v377_v34, -inf  ;;  %v422_v55 = vmul.f32 %v513_v53, %v377_v34 }
 0x3b4   :  { %383 = vmax.xlane.f32.xlu2 %v382_v35 }
 0x3b5   :  { %v424_v56 = vsel %vm58_vm1, %v422_v55, 0.0 }
 0x3b8   :  { %v379_v36 = vpop.f32.mrf.mxu3 }
 0x3b9   :  { %v380_v37 = vadd.f32 %v527_v32, %v379_v36 }
 0x3bb   :  { %v385_v38 = vsel %vm58_vm1, %v380_v37, -inf  ;;  %v423_v58 = vmul.f32 %v514_v57, %v380_v37 }
 0x3bc   :  { %386 = vmax.xlane.f32.xlu2 %v385_v38 }
 0x3bd   :  { %v427_v59 = vsel %vm58_vm1, %v423_v58, 0.0 }
 0x427   :  { %v384_v39 = vpop.xlane.xlu2 %383 }
 0x428   :  { %v388_v40 = vsub.f32 %v377_v34, %v384_v39 }
 0x42a   :  { %v390_v41 = vmul.f32 1.442695, %v388_v40 }
 0x42c   :  { %540 = vpow2.f32 %v390_v41 }
 0x42f   :  { %v387_v42 = vpop.xlane.xlu2 %386 }
 0x430   :  { %v389_v43 = vsub.f32 %v380_v37, %v387_v42 }
 0x432   :  { %v541_v45 = vpop.eup %540  ;;  %v392_v46 = vmul.f32 1.442695, %v389_v43 }
 0x433   :  { %v394_v47 = vsel %vm58_vm1, %v541_v45, 0.0 }
 0x434   :  { %542 = vpow2.f32 %v392_v46  ;;  %395 = vadd.xlane.f32.xlu2 %v394_v47 }
 0x43a   :  { %v543_v50 = vpop.eup %542 }
 0x43b   :  { %v397_v51 = vsel %vm58_vm1, %v543_v50, 0.0 }
 0x43c   :  { %398 = vadd.xlane.f32.xlu2 %v397_v51 }
 0x444   :  { %425 = vadd.xlane.f32.xlu2 %v424_v56 }
 0x44c   :  { %428 = vadd.xlane.f32.xlu2 %v427_v59 }
 0x4a7   :  { %v396_v60 = vpop.xlane.xlu2 %395 }
 0x4a8   :  { %544 = vlog2.f32 %v396_v60 }
 0x4ae   :  { %v545_v63 = vpop.eup %544 }
 0x4af   :  { %v399_v61 = vpop.xlane.xlu2 %398  ;;  %v401_v1 = vmul.f32 0.6931472, %v545_v63 }
 0x4b0   :  { %546 = vlog2.f32 %v399_v61 }
 0x4b1   :  { %v404_v7 = vadd.f32 %v401_v1, %v384_v39 }
 0x4b6   :  { %v547_v3 = vpop.eup %546 }
 0x4b7   :  { %v426_v4 = vpop.xlane.xlu2 %425  ;;  %v403_v6 = vmul.f32 0.6931472, %v547_v3 }
 0x4b8   :  { %v463_v8 = vsub.f32 %v404_v7, %v426_v4 }
 0x4b9   :  { %v405_v11 = vadd.f32 %v403_v6, %v387_v42 }
 0x4ba   :  { %v465_v15 = vmul.f32 %v515_v10, %v463_v8 }
 0x4bc   :  { %v468_v9 = vsel %vm467_vm15, %v465_v15, 0.0 }
 0x4bf   :  { %v429_v13 = vpop.xlane.xlu2 %428 }
 0x4c0   :  { %v464_v16 = vsub.f32 %v405_v11, %v429_v13 }
 0x4c2   :  { %v466_v17 = vmul.f32 %v516_v12, %v464_v16 }
 0x4c4   :  { %v469_v14 = vsel %vm467_vm15, %v466_v17, 0.0 }
 0x4c5   :  { %v470_v18 = vadd.f32 %v469_v14, %v468_v9 }
 0x4c7   :  { %471 = vadd.xlane.f32.xlu1 %v470_v18 }
 0x53a   :  { %v472_v19 = vpop.xlane.xlu1 %471 }
 0x53b   :  { %v473_v20 = vrot.slane %v472_v19, 4 }
 0x53d   :  { %v474_v21 = vadd.f32 %v473_v20, %v472_v19 }
 0x53f   :  { %v475_v22 = vrot.slane %v474_v21, 2 }
 0x541   :  { %v476_v23 = vadd.f32 %v475_v22, %v474_v21 }
 0x543   :  { %v477_v24 = vrot.slane %v476_v23, 1 }
 0x545   :  { %v478_v25 = vadd.f32 %v477_v24, %v476_v23 }
 0x547   :  { %517 = vpush %v478_v25 }
 0x578   :  { %s518_s27 = spop %517 }
 0x579   :  { %481 = sst [smem:[#allocation2]] %s518_s27 }
 0x57a   :  { %490 = dma.smem_to_hbm %s564_s28, 16, %s488_s5, [#allocation3]  }
 0x57b   :  { %560 = dma.done.wait [#allocation3], 16  }
 0x57c   :  { %561 = vsyncadd [#allocation3], 4294967280 }
 0x57d   :  { %495 = sfence }
 0x57e   :  { %496 = vsyncpa [#allocation3], 1 }

</bundles_post_ra>
